<compile_context>
chip_gen: v7x
topology: tpu7x:2x2x1
jax: 0.10.0
libtpu: 0.0.40
codegen_flags: <defaults>
</compile_context>

<pallas_src>
import math
from functools import partial

import jax
import jax.numpy as jnp
from jax.experimental import pallas as pl
from jax.experimental.pallas import tpu as pltpu

_LOG_PI = math.log(math.pi)
_HALF_LOG_2PI = 0.5 * math.log(2.0 * math.pi)


def _round_up(x, m):
    return ((x + m - 1) // m) * m


def _lgamma_pos(z):
    """log(Gamma(z)) for z > 0.

    Recurrence shift by 6 (Gamma(z) = Gamma(z+6) / prod) followed by the
    Stirling asymptotic series at w = z + 6 >= 6.  Cost: 2 logs + 1 divide
    per call (EUP), rest is VPU FMAs.  Absolute error ~1e-6 in f32 for the
    alpha range of evidential regression.
    """
    w = z + 6.0
    r = 1.0 / w
    r2 = r * r
    corr = r * (1.0 / 12.0 + r2 * (-1.0 / 360.0 + r2 * (1.0 / 1260.0)))
    shift = z * (z + 1.0) * (z + 2.0) * (z + 3.0) * (z + 4.0) * (z + 5.0)
    return ((w - 0.5) * jnp.log(w) - w + _HALF_LOG_2PI + corr) - jnp.log(shift)


def _compute_tile_loss(x_ref, reg_weight):
    """x_ref block is (5, D, tile_n): [gamma, v, alpha, beta, targets]."""
    gamma = x_ref[0]
    v = x_ref[1]
    alpha = x_ref[2]
    beta = x_ref[3]
    targets = x_ref[4]

    err = targets - gamma
    gam2 = 2.0 * beta * (1.0 + v)

    nll = (0.5 * (_LOG_PI - jnp.log(v))
           - alpha * jnp.log(gam2)
           + (alpha + 0.5) * jnp.log(gam2 + v * err * err)
           + _lgamma_pos(alpha)
           - _lgamma_pos(alpha + 0.5))

    # L1 norm over the regression-output dim (sublane axis), broadcast back.
    reg = jnp.sum(jnp.abs(err), axis=0, keepdims=True) * (2.0 * v + alpha)
    return nll + reg_weight * reg


def _nig_none_kernel(x_ref, loss_ref, *, reg_weight):
    loss_ref[...] = _compute_tile_loss(x_ref, reg_weight)


def _nig_reduce_kernel(x_ref, red_ref, acc_ref, *,
                       reg_weight, n_valid, scale, needs_mask):
    loss = _compute_tile_loss(x_ref, reg_weight)

    if needs_mask:
        tile_n = loss.shape[-1]
        col = (pl.program_id(0) * tile_n
               + jax.lax.broadcasted_iota(jnp.int32, (1, tile_n), 1))
        loss = jnp.where(col < n_valid, loss, 0.0)

    @pl.when(pl.program_id(0) == 0)
    def _():
        acc_ref[...] = jnp.zeros_like(acc_ref)

    acc_ref[...] += jnp.sum(loss).reshape(1, 1)

    @pl.when(pl.program_id(0) == pl.num_programs(0) - 1)
    def _():
        red_ref[...] = acc_ref[...] * scale  # mean folded into a constant mul


def nig_loss(gamma, v, alpha, beta, targets, *, reg_weight,
             reduction='mean', tile_n=None):
    if reg_weight < 0:
        raise ValueError("The regularization weight should be non-negative.")
    if reduction not in ('none', 'mean', 'sum'):
        raise ValueError(f"{reduction} is not a valid value for reduction.")

    N, D = gamma.shape

    # Lane-dense layout: stack the five fields and transpose -> [5, D, N].
    x = jnp.stack([gamma, v, alpha, beta, targets], axis=0)       # [5, N, D]
    x = jnp.transpose(x, (0, 2, 1)).astype(jnp.float32)           # [5, D, N]

    if tile_n is None:
        target = 16384                       # ~1.3 MB stacked f32 block at D=4
        n_tiles = max(1, -(-N // target))
        tile_n = _round_up(-(-N // n_tiles), 128)
    tile_n = max(128, _round_up(int(tile_n), 128))
    n_pad = _round_up(N, tile_n)
    num_tiles = n_pad // tile_n
    if n_pad != N:
        # Safe (finite) padding values; padded columns are masked / sliced off.
        x = jnp.pad(x, ((0, 0), (0, 0), (0, n_pad - N)), constant_values=1.0)

    in_spec = pl.BlockSpec((5, D, tile_n), lambda i: (0, 0, i))

    if reduction == 'none':
        kern = partial(_nig_none_kernel, reg_weight=float(reg_weight))
        loss_t = pl.pallas_call(
            kern,
            out_shape=jax.ShapeDtypeStruct((D, n_pad), jnp.float32),
            grid_spec=pltpu.PrefetchScalarGridSpec(
                num_scalar_prefetch=0,
                grid=(num_tiles,),
                in_specs=[in_spec],
                out_specs=pl.BlockSpec((D, tile_n), lambda i: (0, i))),
            compiler_params=pltpu.CompilerParams(
                dimension_semantics=("parallel",)),
        )(x)
        return jnp.transpose(loss_t[:, :N])

    # mean / sum: no full-loss writeback at all; only a (1,1) result.
    scale = 1.0 / float(N * D) if reduction == 'mean' else 1.0
    kern = partial(_nig_reduce_kernel,
                   reg_weight=float(reg_weight),
                   n_valid=int(N),
                   scale=float(scale),
                   needs_mask=(n_pad != N))
    # TODO(synk): for v7x megacore, emit per-tile partial sums with a
    # "parallel" grid axis and finish the reduction in the wrapper.
    red = pl.pallas_call(
        kern,
        out_shape=jax.ShapeDtypeStruct((1, 1), jnp.float32),
        grid_spec=pltpu.PrefetchScalarGridSpec(
            num_scalar_prefetch=0,
            grid=(num_tiles,),
            in_specs=[in_spec],
            out_specs=pl.BlockSpec((1, 1), lambda i: (0, 0)),
            scratch_shapes=[pltpu.VMEM((1, 1), jnp.float32)]),
        compiler_params=pltpu.CompilerParams(
            dimension_semantics=("arbitrary",)),
    )(x)
    return red[0, 0]


def _reference(gamma, v, alpha, beta, targets, reg_weight, reduction):
    gam2 = 2.0 * beta * (1.0 + v)
    nll = (0.5 * jnp.log(jnp.pi / v)
           - alpha * jnp.log(gam2)
           + (alpha + 0.5) * jnp.log(gam2 + v * (targets - gamma) ** 2)
           + jax.scipy.special.gammaln(alpha)
           - jax.scipy.special.gammaln(alpha + 0.5))
    reg = jnp.sum(jnp.abs(targets - gamma), axis=1, keepdims=True) * (2.0 * v + alpha)
    loss = nll + reg_weight * reg
    if reduction == 'mean':
        return jnp.mean(loss)
    if reduction == 'sum':
        return jnp.sum(loss)
    return loss


def _make_inputs(key, N, D):
    kg, kv, ka, kb, kt = jax.random.split(key, 5)
    gamma = jax.random.normal(kg, (N, D), jnp.float32)
    v = jax.nn.softplus(jax.random.normal(kv, (N, D), jnp.float32)) + 1e-2
    alpha = 1.0 + jax.nn.softplus(jax.random.normal(ka, (N, D), jnp.float32))
    beta = jax.nn.softplus(jax.random.normal(kb, (N, D), jnp.float32)) + 1e-2
    targets = jax.random.normal(kt, (N, D), jnp.float32)
    return gamma, v, alpha, beta, targets


if __name__ == "__main__":
    reg_weight = 0.1
    key = jax.random.PRNGKey(0)
    k0, k1 = jax.random.split(key)

    # Primary case: batch=128, regression output dim=4.
    g, v, a, b, t = _make_inputs(k0, 128, 4)

    out_mean = jax.block_until_ready(
        nig_loss(g, v, a, b, t, reg_weight=reg_weight, reduction='mean'))
    ref_mean = _reference(g, v, a, b, t, reg_weight, 'mean')
    assert jnp.allclose(out_mean, ref_mean, rtol=1e-4, atol=1e-4), (out_mean, ref_mean)

    out_sum = jax.block_until_ready(
        nig_loss(g, v, a, b, t, reg_weight=reg_weight, reduction='sum'))
    ref_sum = _reference(g, v, a, b, t, reg_weight, 'sum')
    assert jnp.allclose(out_sum, ref_sum, rtol=1e-4, atol=1e-2), (out_sum, ref_sum)

    out_none = jax.block_until_ready(
        nig_loss(g, v, a, b, t, reg_weight=reg_weight, reduction='none'))
    ref_none = _reference(g, v, a, b, t, reg_weight, 'none')
    assert out_none.shape == (128, 4)
    assert jnp.allclose(out_none, ref_none, rtol=1e-4, atol=2e-4)

    # Ragged case (exercises padding + in-kernel masking): batch=200, dim=3.
    g2, v2, a2, b2, t2 = _make_inputs(k1, 200, 3)
    out_m2 = jax.block_until_ready(
        nig_loss(g2, v2, a2, b2, t2, reg_weight=reg_weight, reduction='mean'))
    ref_m2 = _reference(g2, v2, a2, b2, t2, reg_weight, 'mean')
    assert jnp.allclose(out_m2, ref_m2, rtol=1e-4, atol=1e-4), (out_m2, ref_m2)

    print("KERNEL_OK")
</pallas_src>

<mosaic_0001>
module attributes {stable_mosaic.version = 11 : i64} {
  func.func @_nig_reduce_kernel(%arg0: i32, %arg1: memref<5x4x128xf32, #tpu.memory_space<vmem>>, %arg2: memref<1x1xf32, #tpu.memory_space<vmem>>, %arg3: memref<1x1xf32, #tpu.memory_space<vmem>>) attributes {dimension_semantics = [#tpu.dimension_semantics<arbitrary>], iteration_bounds = array<i64: 1>, scalar_prefetch = 0 : i64, scratch_operands = 1 : i64, tpu.core_type = #tpu.core_type<tc>, window_params = [{transform_indices = @transform_0, window_bounds = array<i64: 5, 4, 128>}, {pipeline_mode = #tpu.pipeline_mode<synchronous>, transform_indices = @transform_1, window_bounds = array<i64: 1, 1>}]} {
    %c0 = arith.constant 0 : index
    %c0_0 = arith.constant 0 : index
    %c0_1 = arith.constant 0 : index
    %0 = vector.load %arg1[%c0, %c0_0, %c0_1] : memref<5x4x128xf32, #tpu.memory_space<vmem>>, vector<1x4x128xf32>
    %1 = vector.shape_cast %0 : vector<1x4x128xf32> to vector<4x128xf32>
    %c1 = arith.constant 1 : index
    %c0_2 = arith.constant 0 : index
    %c0_3 = arith.constant 0 : index
    %2 = vector.load %arg1[%c1, %c0_2, %c0_3] : memref<5x4x128xf32, #tpu.memory_space<vmem>>, vector<1x4x128xf32>
    %3 = vector.shape_cast %2 : vector<1x4x128xf32> to vector<4x128xf32>
    %c2 = arith.constant 2 : index
    %c0_4 = arith.constant 0 : index
    %c0_5 = arith.constant 0 : index
    %4 = vector.load %arg1[%c2, %c0_4, %c0_5] : memref<5x4x128xf32, #tpu.memory_space<vmem>>, vector<1x4x128xf32>
    %5 = vector.shape_cast %4 : vector<1x4x128xf32> to vector<4x128xf32>
    %c3 = arith.constant 3 : index
    %c0_6 = arith.constant 0 : index
    %c0_7 = arith.constant 0 : index
    %6 = vector.load %arg1[%c3, %c0_6, %c0_7] : memref<5x4x128xf32, #tpu.memory_space<vmem>>, vector<1x4x128xf32>
    %7 = vector.shape_cast %6 : vector<1x4x128xf32> to vector<4x128xf32>
    %c4 = arith.constant 4 : index
    %c0_8 = arith.constant 0 : index
    %c0_9 = arith.constant 0 : index
    %8 = vector.load %arg1[%c4, %c0_8, %c0_9] : memref<5x4x128xf32, #tpu.memory_space<vmem>>, vector<1x4x128xf32>
    %9 = vector.shape_cast %8 : vector<1x4x128xf32> to vector<4x128xf32>
    %10 = arith.subf %9, %1 : vector<4x128xf32>
    %cst = arith.constant 2.000000e+00 : f32
    %11 = vector.broadcast %cst : f32 to vector<4x128xf32>
    %12 = arith.mulf %11, %7 : vector<4x128xf32>
    %cst_10 = arith.constant 1.000000e+00 : f32
    %13 = vector.broadcast %cst_10 : f32 to vector<4x128xf32>
    %14 = arith.addf %13, %3 : vector<4x128xf32>
    %15 = arith.mulf %12, %14 : vector<4x128xf32>
    %16 = math.log %3 : vector<4x128xf32>
    %cst_11 = arith.constant 1.14472985 : f32
    %17 = vector.broadcast %cst_11 : f32 to vector<4x128xf32>
    %18 = arith.subf %17, %16 : vector<4x128xf32>
    %cst_12 = arith.constant 5.000000e-01 : f32
    %19 = vector.broadcast %cst_12 : f32 to vector<4x128xf32>
    %20 = arith.mulf %19, %18 : vector<4x128xf32>
    %21 = math.log %15 : vector<4x128xf32>
    %22 = arith.mulf %5, %21 : vector<4x128xf32>
    %23 = arith.subf %20, %22 : vector<4x128xf32>
    %cst_13 = arith.constant 5.000000e-01 : f32
    %24 = vector.broadcast %cst_13 : f32 to vector<4x128xf32>
    %25 = arith.addf %5, %24 : vector<4x128xf32>
    %26 = arith.mulf %3, %10 : vector<4x128xf32>
    %27 = arith.mulf %26, %10 : vector<4x128xf32>
    %28 = arith.addf %15, %27 : vector<4x128xf32>
    %29 = math.log %28 : vector<4x128xf32>
    %30 = arith.mulf %25, %29 : vector<4x128xf32>
    %31 = arith.addf %23, %30 : vector<4x128xf32>
    %cst_14 = arith.constant 6.000000e+00 : f32
    %32 = vector.broadcast %cst_14 : f32 to vector<4x128xf32>
    %33 = arith.addf %5, %32 : vector<4x128xf32>
    %cst_15 = arith.constant 1.000000e+00 : f32
    %34 = vector.broadcast %cst_15 : f32 to vector<4x128xf32>
    %35 = arith.divf %34, %33 : vector<4x128xf32>
    %36 = arith.mulf %35, %35 : vector<4x128xf32>
    %cst_16 = arith.constant 7.93650805E-4 : f32
    %37 = vector.broadcast %cst_16 : f32 to vector<4x128xf32>
    %38 = arith.mulf %36, %37 : vector<4x128xf32>
    %cst_17 = arith.constant -0.00277777785 : f32
    %39 = vector.broadcast %cst_17 : f32 to vector<4x128xf32>
    %40 = arith.addf %39, %38 : vector<4x128xf32>
    %41 = arith.mulf %36, %40 : vector<4x128xf32>
    %cst_18 = arith.constant 0.0833333358 : f32
    %42 = vector.broadcast %cst_18 : f32 to vector<4x128xf32>
    %43 = arith.addf %42, %41 : vector<4x128xf32>
    %44 = arith.mulf %35, %43 : vector<4x128xf32>
    %cst_19 = arith.constant 1.000000e+00 : f32
    %45 = vector.broadcast %cst_19 : f32 to vector<4x128xf32>
    %46 = arith.addf %5, %45 : vector<4x128xf32>
    %47 = arith.mulf %5, %46 : vector<4x128xf32>
    %cst_20 = arith.constant 2.000000e+00 : f32
    %48 = vector.broadcast %cst_20 : f32 to vector<4x128xf32>
    %49 = arith.addf %5, %48 : vector<4x128xf32>
    %50 = arith.mulf %47, %49 : vector<4x128xf32>
    %cst_21 = arith.constant 3.000000e+00 : f32
    %51 = vector.broadcast %cst_21 : f32 to vector<4x128xf32>
    %52 = arith.addf %5, %51 : vector<4x128xf32>
    %53 = arith.mulf %50, %52 : vector<4x128xf32>
    %cst_22 = arith.constant 4.000000e+00 : f32
    %54 = vector.broadcast %cst_22 : f32 to vector<4x128xf32>
    %55 = arith.addf %5, %54 : vector<4x128xf32>
    %56 = arith.mulf %53, %55 : vector<4x128xf32>
    %cst_23 = arith.constant 5.000000e+00 : f32
    %57 = vector.broadcast %cst_23 : f32 to vector<4x128xf32>
    %58 = arith.addf %5, %57 : vector<4x128xf32>
    %59 = arith.mulf %56, %58 : vector<4x128xf32>
    %cst_24 = arith.constant 5.000000e-01 : f32
    %60 = vector.broadcast %cst_24 : f32 to vector<4x128xf32>
    %61 = arith.subf %33, %60 : vector<4x128xf32>
    %62 = math.log %33 : vector<4x128xf32>
    %63 = arith.mulf %61, %62 : vector<4x128xf32>
    %64 = arith.subf %63, %33 : vector<4x128xf32>
    %cst_25 = arith.constant 0.918938517 : f32
    %65 = vector.broadcast %cst_25 : f32 to vector<4x128xf32>
    %66 = arith.addf %64, %65 : vector<4x128xf32>
    %67 = arith.addf %66, %44 : vector<4x128xf32>
    %68 = math.log %59 : vector<4x128xf32>
    %69 = arith.subf %67, %68 : vector<4x128xf32>
    %70 = arith.addf %31, %69 : vector<4x128xf32>
    %cst_26 = arith.constant 5.000000e-01 : f32
    %71 = vector.broadcast %cst_26 : f32 to vector<4x128xf32>
    %72 = arith.addf %5, %71 : vector<4x128xf32>
    %cst_27 = arith.constant 6.000000e+00 : f32
    %73 = vector.broadcast %cst_27 : f32 to vector<4x128xf32>
    %74 = arith.addf %72, %73 : vector<4x128xf32>
    %cst_28 = arith.constant 1.000000e+00 : f32
    %75 = vector.broadcast %cst_28 : f32 to vector<4x128xf32>
    %76 = arith.divf %75, %74 : vector<4x128xf32>
    %77 = arith.mulf %76, %76 : vector<4x128xf32>
    %cst_29 = arith.constant 7.93650805E-4 : f32
    %78 = vector.broadcast %cst_29 : f32 to vector<4x128xf32>
    %79 = arith.mulf %77, %78 : vector<4x128xf32>
    %cst_30 = arith.constant -0.00277777785 : f32
    %80 = vector.broadcast %cst_30 : f32 to vector<4x128xf32>
    %81 = arith.addf %80, %79 : vector<4x128xf32>
    %82 = arith.mulf %77, %81 : vector<4x128xf32>
    %cst_31 = arith.constant 0.0833333358 : f32
    %83 = vector.broadcast %cst_31 : f32 to vector<4x128xf32>
    %84 = arith.addf %83, %82 : vector<4x128xf32>
    %85 = arith.mulf %76, %84 : vector<4x128xf32>
    %cst_32 = arith.constant 1.000000e+00 : f32
    %86 = vector.broadcast %cst_32 : f32 to vector<4x128xf32>
    %87 = arith.addf %72, %86 : vector<4x128xf32>
    %88 = arith.mulf %72, %87 : vector<4x128xf32>
    %cst_33 = arith.constant 2.000000e+00 : f32
    %89 = vector.broadcast %cst_33 : f32 to vector<4x128xf32>
    %90 = arith.addf %72, %89 : vector<4x128xf32>
    %91 = arith.mulf %88, %90 : vector<4x128xf32>
    %cst_34 = arith.constant 3.000000e+00 : f32
    %92 = vector.broadcast %cst_34 : f32 to vector<4x128xf32>
    %93 = arith.addf %72, %92 : vector<4x128xf32>
    %94 = arith.mulf %91, %93 : vector<4x128xf32>
    %cst_35 = arith.constant 4.000000e+00 : f32
    %95 = vector.broadcast %cst_35 : f32 to vector<4x128xf32>
    %96 = arith.addf %72, %95 : vector<4x128xf32>
    %97 = arith.mulf %94, %96 : vector<4x128xf32>
    %cst_36 = arith.constant 5.000000e+00 : f32
    %98 = vector.broadcast %cst_36 : f32 to vector<4x128xf32>
    %99 = arith.addf %72, %98 : vector<4x128xf32>
    %100 = arith.mulf %97, %99 : vector<4x128xf32>
    %cst_37 = arith.constant 5.000000e-01 : f32
    %101 = vector.broadcast %cst_37 : f32 to vector<4x128xf32>
    %102 = arith.subf %74, %101 : vector<4x128xf32>
    %103 = math.log %74 : vector<4x128xf32>
    %104 = arith.mulf %102, %103 : vector<4x128xf32>
    %105 = arith.subf %104, %74 : vector<4x128xf32>
    %cst_38 = arith.constant 0.918938517 : f32
    %106 = vector.broadcast %cst_38 : f32 to vector<4x128xf32>
    %107 = arith.addf %105, %106 : vector<4x128xf32>
    %108 = arith.addf %107, %85 : vector<4x128xf32>
    %109 = math.log %100 : vector<4x128xf32>
    %110 = arith.subf %108, %109 : vector<4x128xf32>
    %111 = arith.subf %70, %110 : vector<4x128xf32>
    %112 = math.absf %10 : vector<4x128xf32>
    %cst_39 = arith.constant dense<0.000000e+00> : vector<128xf32>
    %113 = vector.multi_reduction <add>, %112, %cst_39 [0] : vector<4x128xf32> to vector<128xf32>
    %114 = vector.shape_cast %113 : vector<128xf32> to vector<1x128xf32>
    %cst_40 = arith.constant 2.000000e+00 : f32
    %115 = vector.broadcast %cst_40 : f32 to vector<4x128xf32>
    %116 = arith.mulf %115, %3 : vector<4x128xf32>
    %117 = arith.addf %116, %5 : vector<4x128xf32>
    %118 = vector.broadcast %114 : vector<1x128xf32> to vector<4x128xf32>
    %119 = arith.mulf %118, %117 : vector<4x128xf32>
    %cst_41 = arith.constant 1.000000e-01 : f32
    %120 = vector.broadcast %cst_41 : f32 to vector<4x128xf32>
    %121 = arith.mulf %120, %119 : vector<4x128xf32>
    %122 = arith.addf %111, %121 : vector<4x128xf32>
    %c0_i32 = arith.constant 0 : i32
    %123 = arith.cmpi eq, %arg0, %c0_i32 : i32
    %124 = arith.extui %123 : i1 to i32
    %c0_i32_42 = arith.constant 0 : i32
    %125 = arith.cmpi ne, %124, %c0_i32_42 : i32
    scf.if %125 {
      %cst_50 = arith.constant 0.000000e+00 : f32
      %137 = vector.broadcast %cst_50 : f32 to vector<1x1xf32>
      %c0_51 = arith.constant 0 : index
      %c0_52 = arith.constant 0 : index
      %138 = vector.load %arg3[%c0_51, %c0_52] : memref<1x1xf32, #tpu.memory_space<vmem>>, vector<1x1xf32>
      tpu.vector_store %arg3[%c0_51, %c0_52], %137 {strides = array<i32>} : memref<1x1xf32, #tpu.memory_space<vmem>>, vector<1x1xf32>,
    } else {
    }
    %c0_43 = arith.constant 0 : index
    %c0_44 = arith.constant 0 : index
    %126 = vector.load %arg3[%c0_43, %c0_44] : memref<1x1xf32, #tpu.memory_space<vmem>>, vector<1x1xf32>
    %127 = vector.shape_cast %122 : vector<4x128xf32> to vector<1x4x128xf32>
    %cst_45 = arith.constant dense<0.000000e+00> : vector<1xf32>
    %128 = vector.multi_reduction <add>, %127, %cst_45 [1, 2] : vector<1x4x128xf32> to vector<1xf32>
    %129 = vector.shape_cast %128 : vector<1xf32> to vector<1x1x1xf32>
    %130 = vector.extract %129[0, 0, 0] : f32 from vector<1x1x1xf32>
    %131 = vector.broadcast %130 : f32 to vector<1x1xf32>
    %132 = arith.addf %126, %131 : vector<1x1xf32>
    %c0_46 = arith.constant 0 : index
    %c0_47 = arith.constant 0 : index
    %133 = vector.load %arg3[%c0_46, %c0_47] : memref<1x1xf32, #tpu.memory_space<vmem>>, vector<1x1xf32>
    tpu.vector_store %arg3[%c0_46, %c0_47], %132 {strides = array<i32>} : memref<1x1xf32, #tpu.memory_space<vmem>>, vector<1x1xf32>,
    %c0_i32_48 = arith.constant 0 : i32
    %134 = arith.cmpi eq, %arg0, %c0_i32_48 : i32
    %135 = arith.extui %134 : i1 to i32
    %c0_i32_49 = arith.constant 0 : i32
    %136 = arith.cmpi ne, %135, %c0_i32_49 : i32
    scf.if %136 {
      %c0_50 = arith.constant 0 : index
      %c0_51 = arith.constant 0 : index
      %137 = vector.load %arg3[%c0_50, %c0_51] : memref<1x1xf32, #tpu.memory_space<vmem>>, vector<1x1xf32>
      %cst_52 = arith.constant 0.001953125 : f32
      %138 = vector.broadcast %cst_52 : f32 to vector<1x1xf32>
      %139 = arith.mulf %137, %138 : vector<1x1xf32>
      %c0_53 = arith.constant 0 : index
      %c0_54 = arith.constant 0 : index
      %140 = vector.load %arg2[%c0_53, %c0_54] : memref<1x1xf32, #tpu.memory_space<vmem>>, vector<1x1xf32>
      tpu.vector_store %arg2[%c0_53, %c0_54], %139 {strides = array<i32>} : memref<1x1xf32, #tpu.memory_space<vmem>>, vector<1x1xf32>,
    } else {
    }
    return
  }
  func.func @transform_0(%arg0: i32) -> (i32, i32, i32) {
    %c0_i32 = arith.constant 0 : i32
    %c0_i32_0 = arith.constant 0 : i32
    %c0_i32_1 = arith.constant 0 : i32
    return %c0_i32, %c0_i32_0, %arg0 : i32, i32, i32
  }
  func.func @transform_1(%arg0: i32) -> (i32, i32) {
    %c0_i32 = arith.constant 0 : i32
    %c0_i32_0 = arith.constant 0 : i32
    %c0_i32_1 = arith.constant 0 : i32
    return %c0_i32, %c0_i32_0 : i32, i32
  }
}

</mosaic_0001>

<bundles_post_ra>
// kernel: tpu_custom_call.1
= control target key start
LH: loop header
LB: loop body
LE: loop exit
PB: predicated region body
PF: predicated region fallthrough
CT: control target
= control target key end

     0   :  { %6 = vsyncpa [#allocation4], 0  ;;  %s327_s0 = inlined_call_operand.hbm [shape: f32[5,4,128], index: 0, kind: input, shape index: {}]   ;;  %s328_s1 = inlined_call_operand.hbm [shape: f32[1,1], index: 1, kind: output, shape index: {}]  }
   0x1   :  { %7 = vsyncpa [#allocation5], 0  ;;  %s243_s6 = smov [#allocation3]   ;;  %s195_s10 = scalar_lea.hbm %s327_s0, 320 }
   0x2   :  { %s13_s7 = sshll.u32 %s243_s6, 4  ;;  %p196_p0 = scmp.ne.s32.totalorder %s327_s0, %s195_s10  ;;  %s14_s7 = int_to_ptr.vmem [resolvable:$true] %s13_s7 }
   0x3   :  { %p199_p1 = scmp.lt.u32.totalorder %s195_s10, %s327_s0 }
   0x5   :  { %p201_p2 = pnand %p199_p1, %p196_p0 }
   0x7   :  { %204 = shalt.err (!%p201_p2)
}
   0x8   :  { %s205_s15 = scalar_lea.vmem %s14_s7, 320  ;;  %p210_p4 = scmp.lt.s32.totalorder %s14_s7, %s14_s7 }
   0x9   :  { %p206_p3 = scmp.ne.s32.totalorder %s14_s7, %s205_s15  ;;  %p211_p5 = scmp.lt.s32.totalorder %s205_s15, %s205_s15 }
   0xb   :  { %p212_p6 = por %p211_p5, %p210_p4 }
   0xd   :  { %p213_p7 = pnand %p212_p6, %p206_p3 }
   0xf   :  { %216 = shalt.err (!%p213_p7)
}
  0x10   :  { %s244_s16 = smov 64   ;;  %s245_s17 = smov 4  }
  0x11   :  { %19 = dma.hbm_to_vmem [thread:$0]  %s327_s0, 320, %s14_s7, [#allocation4], %s244_s16, %s244_s16, %s245_s17  }
  0x12   :  { %239 = dma.done.wait [#allocation4], 320  }
  0x13   :  { %240 = vsyncadd [#allocation4], 4294966976  ;;  %v23_v0 = vld [vmem:[#allocation3] sm:$0xf]  ;;  %v270_v1 = vld [vmem:[#allocation3 + $0x4] sm:$0xf] }
  0x14   :  { %v272_v2 = vld [vmem:[#allocation3 + $0x8] sm:$0xf]  ;;  %v29_v3 = vld [vmem:[#allocation3 + $0xc] sm:$0xf]  ;;  %v31_v4 = vld [vmem:[#allocation3 + $0x10] sm:$0xf]  ;;  %177 = vlog2.f32 %v270_v1 }
  0x15   :  { %v34_v5 = vadd.f32 1.0, %v270_v1  ;;  %v277_v6 = vadd.f32 0.5, %v272_v2  ;;  %v32_v7 = vsub.f32 %v31_v4, %v23_v0  ;;  %v33_v8 = vmul.f32 2.0, %v29_v3  ;;  %s247_s20 = smov [#allocation6]  }
  0x16   :  { %v280_v9 = vadd.f32 6.0, %v272_v2  ;;  %v61_v10 = vadd.f32 1.0, %v272_v2  ;;  %v63_v11 = vadd.f32 2.0, %v272_v2  ;;  %v65_v12 = vadd.f32 3.0, %v272_v2  ;;  %s159_s21 = sshll.u32 %s247_s20, 4  ;;  %s160_s21 = int_to_ptr.vmem [resolvable:$true] %s159_s21 }
  0x17   :  { %v35_v13 = vmul.f32 %v34_v5, %v33_v8  ;;  %v45_v14 = vmul.f32 %v32_v7, %v270_v1  ;;  %v67_v16 = vadd.f32 4.0, %v272_v2  ;;  %v291_v17 = vadd.f32 6.0, %v277_v6  ;;  %s217_s22 = scalar_lea.vmem %s160_s21, 16  ;;  %s221_s23 = scalar_lea.vmem %s160_s21, 32 }
  0x18   :  { %179 = vrcp.f32 %v280_v9  ;;  %v62_v15 = vmul.f32 %v61_v10, %v272_v2  ;;  %v91_v18 = vadd.f32 1.0, %v277_v6  ;;  %v93_v21 = vadd.f32 2.0, %v277_v6  ;;  %p218_p8 = scmp.ne.s32.totalorder %s160_s21, %s217_s22  ;;  %p222_p9 = scmp.lt.s32.totalorder %s160_s21, %s160_s21 }
  0x19   :  { %181 = vlog2.f32 %v280_v9  ;;  %v46_v19 = vmul.f32 %v45_v14, %v32_v7  ;;  %v95_v23 = vadd.f32 3.0, %v277_v6  ;;  %v69_v26 = vadd.f32 5.0, %v272_v2  ;;  %p223_p10 = scmp.lt.s32.totalorder %s221_s23, %s217_s22 }
  0x1a   :  { %183 = vlog2.f32 %v35_v13  ;;  %v64_v20 = vmul.f32 %v63_v11, %v62_v15  ;;  %v92_v22 = vmul.f32 %v91_v18, %v277_v6  ;;  %vm113_vm0 = vcmask 1043456  }
  0x1b   :  { %185 = vrcp.f32 %v291_v17  ;;  %v47_v24 = vadd.f32 %v46_v19, %v35_v13  ;;  %v97_v28 = vadd.f32 4.0, %v277_v6  ;;  %v112_v29 = vand.u32 2147483647, %v32_v7  ;;  %p224_p11 = por %p223_p10, %p222_p9 }
  0x1c   :  { %v66_v25 = vmul.f32 %v65_v12, %v64_v20  ;;  %v94_v27 = vmul.f32 %v93_v21, %v92_v22  ;;  %187 = vlog2.f32 %v291_v17  ;;  %v99_v33 = vadd.f32 5.0, %v277_v6 }
  0x1d   :  { %189 = vlog2.f32 %v47_v24  ;;  %v114_v34 = vsel %vm113_vm0, %v112_v29, 0.0  ;;  %v168_v40 = vadd.f32 -0.5, %v280_v9  ;;  %v169_v54 = vadd.f32 -0.5, %v291_v17  ;;  %p225_p12 = pnand %p224_p11, %p218_p8 }
  0x1e   :  { %v68_v30 = vmul.f32 %v67_v16, %v66_v25  ;;  %v178_v31 = vpop.eup %177  ;;  %v96_v32 = vmul.f32 %v95_v23, %v94_v27  ;;  %v115_v37 = vrot.slane %v114_v34, 4  ;;  %v121_v60 = vmul.f32 2.0, %v270_v1 }
  0x1f   :  { %v37_v35 = vmul.f32 0.6931472, %v178_v31  ;;  %vm130_vm1 = vcmask 0  }
  0x20   :  { %v70_v36 = vmul.f32 %v69_v26, %v68_v30  ;;  %v98_v38 = vmul.f32 %v97_v28, %v96_v32  ;;  %v116_v41 = vadd.f32 %v115_v37, %v114_v34  ;;  %v122_v18 = vadd.f32 %v121_v60, %v272_v2 }
  0x21   :  { %v38_v43 = vsub.f32 1.1447299, %v37_v35 }
  0x22   :  { %v180_v39 = vpop.eup %179  ;;  %191 = vlog2.f32 %v70_v36  ;;  %v100_v45 = vmul.f32 %v99_v33, %v98_v38  ;;  %v117_v48 = vrot.slane %v116_v41, 2 }
  0x23   :  { %v182_v42 = vpop.eup %181  ;;  %v55_v44 = vmul.f32 %v180_v39, %v180_v39  ;;  %v39_v57 = vmul.f32 0.5, %v38_v43 }
  0x24   :  { %v184_v46 = vpop.eup %183  ;;  %v73_v47 = vmul.f32 0.6931472, %v182_v42  ;;  %193 = vlog2.f32 %v100_v45  ;;  %v118_v55 = vadd.f32 %v117_v48, %v116_v41 }
  0x25   :  { %v186_v49 = vpop.eup %185  ;;  %v41_v50 = vmul.f32 0.6931472, %v184_v46  ;;  %v56_v51 = vmul.f32 0.0007936508, %v55_v44 }
  0x26   :  { %v74_v52 = vmul.f32 %v168_v40, %v73_v47  ;;  %v85_v53 = vmul.f32 %v186_v49, %v186_v49  ;;  %v188_v56 = vpop.eup %187  ;;  %v119_v3 = vrot.slane %v118_v55, 1 }
  0x27   :  { %v42_v58 = vmul.f32 %v41_v50, %v272_v2  ;;  %v57_v59 = vadd.f32 -0.0027777778, %v56_v51  ;;  %v190_v61 = vpop.eup %189  ;;  %v103_v0 = vmul.f32 0.6931472, %v188_v56  ;;  %v246_v2 = vmov 0.0  }
  0x28   :  { %v75_v62 = vsub.f32 %v74_v52, %v280_v9  ;;  %v86_v63 = vmul.f32 0.0007936508, %v85_v53  ;;  %v49_v4 = vmul.f32 0.6931472, %v190_v61  ;;  %v120_v1 = vadd.f32 %v119_v3, %v118_v55  ;;  %131 = vst.msk [vmem:[#allocation2] sm:$0x1] %vm130_vm1, %v246_v2 }
  0x29   :  { %v58_v5 = vmul.f32 %v57_v59, %v55_v44  ;;  %v104_v8 = vmul.f32 %v169_v54, %v103_v0  ;;  %v43_v10 = vsub.f32 %v39_v57, %v42_v58 }
  0x2a   :  { %v87_v7 = vadd.f32 -0.0027777778, %v86_v63  ;;  %v50_v11 = vmul.f32 %v49_v4, %v277_v6  ;;  %v76_v13 = vadd.f32 0.9189385, %v75_v62  ;;  %v123_v27 = vmul.f32 %v122_v18, %v120_v1 }
  0x2b   :  { %v59_v12 = vadd.f32 0.083333336, %v58_v5  ;;  %v105_v16 = vsub.f32 %v104_v8, %v291_v17 }
  0x2c   :  { %v192_v14 = vpop.eup %191  ;;  %v88_v15 = vmul.f32 %v87_v7, %v85_v53  ;;  %v51_v23 = vadd.f32 %v50_v11, %v43_v10  ;;  %v124_v31 = vmul.f32 0.1, %v123_v27 }
  0x2d   :  { %v60_v9 = vmul.f32 %v180_v39, %v59_v12  ;;  %v79_v19 = vmul.f32 0.6931472, %v192_v14  ;;  %v106_v21 = vadd.f32 0.9189385, %v105_v16 }
  0x2e   :  { %v89_v20 = vadd.f32 0.083333336, %v88_v15  ;;  %v194_v22 = vpop.eup %193 }
  0x2f   :  { %v77_v24 = vadd.f32 %v76_v13, %v60_v9  ;;  %v109_v26 = vmul.f32 0.6931472, %v194_v22  ;;  %v132_v41 = vld [vmem:[#allocation2] sm:$0x1] }
  0x30   :  { %v90_v25 = vmul.f32 %v186_v49, %v89_v20 }
  0x31   :  { %v80_v6 = vsub.f32 %v77_v24, %v79_v19 }
  0x32   :  { %v107_v28 = vadd.f32 %v106_v21, %v90_v25 }
  0x33   :  { %v81_v29 = vadd.f32 %v80_v6, %v51_v23 }
  0x34   :  { %v110_v30 = vsub.f32 %v107_v28, %v109_v26 }
  0x36   :  { %v111_v32 = vsub.f32 %v81_v29, %v110_v30 }
  0x38   :  { %v125_v17 = vadd.f32 %v124_v31, %v111_v32 }
  0x3a   :  { %v133_v33 = vsel %vm113_vm0, %v125_v17, 0.0 }
  0x3b   :  { %134 = vadd.xlane.f32.xlu0 %v133_v33 }
  0xc8   :  { %v135_v34 = vpop.xlane.xlu0 %134 }
  0xc9   :  { %v136_v35 = vrot.slane %v135_v34, 4 }
  0xcb   :  { %v137_v36 = vadd.f32 %v136_v35, %v135_v34 }
  0xcd   :  { %v138_v37 = vrot.slane %v137_v36, 2 }
  0xcf   :  { %v139_v38 = vadd.f32 %v138_v37, %v137_v36 }
  0xd1   :  { %v140_v39 = vrot.slane %v139_v38, 1 }
  0xd3   :  { %v141_v40 = vadd.f32 %v140_v39, %v139_v38 }
  0xd5   :  { %170 = vpush %v141_v40 }
 0x106   :  { %s171_s0 = spop %170 }
 0x107   :  { %v143_v42 = vstv %s171_s0 }
 0x108   :  { %v144_v43 = vadd.f32 %v143_v42, %v132_v41 }
 0x10a   :  { %146 = vst.msk [vmem:[#allocation2] sm:$0x1] %vm130_vm1, %v144_v43 }
 0x111   :  { %v150_v44 = vld [vmem:[#allocation2] sm:$0x1] }
 0x112   :  { %v151_v45 = vmul.f32 0.001953125, %v150_v44 }
 0x114   :  { %152 = vst.msk [vmem:[#allocation6] sm:$0x1] %vm130_vm1, %v151_v45 }
 0x115   :  { %228 = shalt.err (!%p225_p12)
}
 0x116   :  { %s229_s26 = scalar_lea.hbm %s328_s1, 16 }
 0x117   :  { %p230_p13 = scmp.ne.s32.totalorder %s328_s1, %s229_s26  ;;  %p233_p0 = scmp.lt.u32.totalorder %s229_s26, %s328_s1 }
 0x119   :  { %p235_p1 = pnand %p233_p0, %p230_p13 }
 0x11b   :  { %238 = shalt.err (!%p235_p1)
}
 0x11c   :  { %162 = dma.vmem_to_hbm [thread:$0]  %s160_s21, 16, %s328_s1, [#allocation5]  }
 0x11d   :  { %241 = dma.done.wait [#allocation5], 16  }
 0x11e   :  { %242 = vsyncadd [#allocation5], 4294967280 }
 0x11f   :  { %166 = vsyncpa [#allocation4], 1 }
 0x120   :  { %167 = vsyncpa [#allocation5], 1 }

</bundles_post_ra>
